<compile_context>
chip_gen: v6e
topology: v6e:2x2x1
jax: 0.10.0
libtpu: 0.0.40
codegen_flags: <defaults>
</compile_context>

<pallas_src>
import functools
import math

import numpy as np
import jax
import jax.numpy as jnp
from jax.experimental import pallas as pl
from jax.experimental.pallas import tpu as pltpu

_LANES = 128
_TARGET_BLOCK_BYTES = 2 << 20  # 2 MiB/block; double-buffered output = 4 MiB


def _div_term(d_model: int, n: int) -> np.ndarray:
    """Shared with the reference so the kernel's frequencies are bit-identical."""
    return np.exp(
        np.arange(0, d_model, 2).astype(np.float32) * -(np.log(n) / d_model)
    ).astype(np.float32)


def _lane_params(d_model: int, w: int, n: int) -> np.ndarray:
    """(3, w) per-lane constants: [frequency, folded-position offset, is_cos]."""
    j = np.arange(w)
    dim_idx = j % d_model
    freq = _div_term(d_model, n)[dim_idx // 2].astype(np.float32)
    pos_off = (j // d_model).astype(np.float32)
    is_cos = (dim_idx % 2).astype(np.float32)
    return np.stack([freq, pos_off, is_cos], axis=0).astype(np.float32)


def _pe_kernel(params_ref, o_ref, *, tm: int, r: int):
    """Writes one (tm, w) tile of the (possibly lane-folded) PE table.

    w == r * d_model; each output row packs r consecutive positions so stores are
    full 128-lane vst's. params_ref is (3, w): [freq, pos_offset, is_cos].
    """
    freq = params_ref[0:1, :]                                   # (1, w)
    is_cos = params_ref[2:3, :]                                 # (1, w)

    row0 = pl.program_id(0) * tm
    row = (jax.lax.broadcasted_iota(jnp.int32, (tm, 1), 0) + row0).astype(jnp.float32)

    if r == 1:
        pos = row                                               # (tm, 1), exact integer
    else:
        pos_off = params_ref[1:2, :]                            # (1, w)
        pos = row * jnp.float32(r) + pos_off                    # (tm, w), exact integer

    # Single f32 multiply -> bit-identical to the reference's position * div_term.
    arg = pos * freq                                            # (tm, w)
    o_ref[...] = jnp.where(is_cos != 0.0, jnp.cos(arg), jnp.sin(arg))


def _choose_tile_rows(rows_total: int, w: int) -> int:
    """Row tile: big enough to amortize grid-step overhead, small enough for VMEM,
    and (for non-trivial tables) guaranteeing >= 2 blocks so v7x uses both cores."""
    bytes_per_row = w * 4
    tm = max(1, _TARGET_BLOCK_BYTES // bytes_per_row)
    if rows_total * bytes_per_row > (1 << 20):                  # non-trivial table
        tm = min(tm, max(8, rows_total // 2))                   # >= 2 grid blocks
    if tm >= rows_total:
        return rows_total
    tm = max(8, (tm // 8) * 8)
    if tm >= rows_total:
        return rows_total
    # Prefer an exact divisor, but never shrink below half the target tile
    # (awkward factorizations get one padded trailing block instead).
    for cand in range(tm, max(tm // 2, 8) - 1, -8):
        if rows_total % cand == 0:
            return cand
    return tm


def positional_encoding(seq_len: int, d_model: int, n: int = 10000) -> jax.Array:
    """Returns the (seq_len, d_model) float32 sinusoidal positional-encoding table."""
    assert d_model % 2 == 0, "d_model must be even (sin/cos pairs)"
    total = seq_len * d_model

    # Lane-dense layout: fold r rows into the lane dim so w = r*d_model is a
    # multiple of 128 (full unmasked stores), whenever seq_len permits it.
    r = _LANES // math.gcd(d_model, _LANES)
    if r > 1 and seq_len % r == 0:
        w = r * d_model
    else:
        r, w = 1, d_model
    rows_total = total // w                                      # == seq_len // r

    tm = _choose_tile_rows(rows_total, w)
    num_blocks = pl.cdiv(rows_total, tm)
    padded_rows = num_blocks * tm

    kernel = functools.partial(_pe_kernel, tm=tm, r=r)
    lane_params = jnp.asarray(_lane_params(d_model, w, n))

    def build(params):
        out = pl.pallas_call(
            kernel,
            out_shape=jax.ShapeDtypeStruct((padded_rows, w), jnp.float32),
            grid=(num_blocks,),
            in_specs=[pl.BlockSpec((3, w), lambda i: (0, 0))],
            out_specs=pl.BlockSpec((tm, w), lambda i: (i, 0)),
            compiler_params=pltpu.CompilerParams(dimension_semantics=("parallel",)),
            cost_estimate=pl.CostEstimate(
                flops=3 * total, transcendentals=2 * total, bytes_accessed=total * 4
            ),
        )(params)
        if padded_rows != rows_total:
            out = out[:rows_total]
        return out.reshape(seq_len, d_model)

    # jit so the trailing slice / reshape fuse with the kernel output instead of an
    # extra eager full-table HBM round trip.
    return jax.jit(build)(lane_params)


class PositionalEncoding:
    """Pallas equivalent of the PyTorch module: builds `pe` once, forward returns it."""

    def __init__(self, seq_len: int, d_model: int, n: int = 10000) -> None:
        self.pe = positional_encoding(seq_len, d_model, n)

    def __call__(self) -> jax.Array:
        return self.pe

    def forward(self) -> jax.Array:
        return self.pe


def _reference_pe(seq_len: int, d_model: int, n: int = 10000) -> np.ndarray:
    pe = np.zeros((seq_len, d_model), dtype=np.float32)
    position = np.arange(0, seq_len)[:, None].astype(np.float32)
    div_term = _div_term(d_model, n)
    final_multiplier = position * div_term
    pe[:, 1::2] = np.cos(final_multiplier)
    pe[:, 0::2] = np.sin(final_multiplier)
    return pe


if __name__ == "__main__":
    # Module has no runtime inputs; key kept only for the determinism convention.
    _ = jax.random.PRNGKey(0)

    # 1) Small shape implied by the module (seq_len=8, d_model=32) — lane-folded (r=4).
    #    Arguments are tiny, so tolerances are tight.
    module = PositionalEncoding(seq_len=8, d_model=32)
    pe_small = jax.block_until_ready(module.forward())
    np.testing.assert_allclose(
        np.asarray(pe_small), _reference_pe(8, 32), rtol=1e-5, atol=1e-5
    )

    # 2) Generalized lane folding (d_model=48 -> r=8, w=384), single block.
    #    f32 sin/cos range reduction at |arg| up to ~1e3 -> modest absolute tolerance.
    pe_mid = jax.block_until_ready(positional_encoding(1024, 48))
    np.testing.assert_allclose(
        np.asarray(pe_mid), _reference_pe(1024, 48), rtol=1e-3, atol=2e-4
    )

    # 3) Larger, unfolded, multi-block "parallel" path (>= 2 blocks for v7x megacore).
    #    f32 sin/cos of arguments up to ~4e3 differ from numpy by O(ulp(arg)) ~ 1e-4.
    pe_big = jax.block_until_ready(positional_encoding(4096, 256))
    np.testing.assert_allclose(
        np.asarray(pe_big), _reference_pe(4096, 256), rtol=2e-3, atol=2e-3
    )

    print("KERNEL_OK")
</pallas_src>

<mosaic_0001>
module attributes {stable_mosaic.version = 11 : i64} {
  func.func @_pe_kernel(%arg0: i32, %arg1: memref<3x128xf32, #tpu.memory_space<vmem>>, %arg2: memref<2x128xf32, #tpu.memory_space<vmem>>) attributes {dimension_semantics = [#tpu.dimension_semantics<parallel>], iteration_bounds = array<i64: 1>, scalar_prefetch = 0 : i64, scratch_operands = 0 : i64, tpu.core_type = #tpu.core_type<tc>, window_params = [{pipeline_mode = #tpu.pipeline_mode<synchronous>, transform_indices = @transform_0, window_bounds = array<i64: 3, 128>}, {transform_indices = @transform_1, window_bounds = array<i64: 2, 128>}]} {
    %c0 = arith.constant 0 : index
    %c0_0 = arith.constant 0 : index
    %0 = vector.load %arg1[%c0, %c0_0] : memref<3x128xf32, #tpu.memory_space<vmem>>, vector<1x128xf32>
    %c2 = arith.constant 2 : index
    %c0_1 = arith.constant 0 : index
    %1 = vector.load %arg1[%c2, %c0_1] : memref<3x128xf32, #tpu.memory_space<vmem>>, vector<1x128xf32>
    %c2_i32 = arith.constant 2 : i32
    %2 = arith.muli %arg0, %c2_i32 : i32
    %3 = tpu.iota {dimensions = array<i32: 0>} : vector<2x1xi32>
    %4 = vector.broadcast %2 : i32 to vector<2x1xi32>
    %5 = arith.addi %3, %4 : vector<2x1xi32>
    %6 = arith.sitofp %5 : vector<2x1xi32> to vector<2x1xf32>
    %c1 = arith.constant 1 : index
    %c0_2 = arith.constant 0 : index
    %7 = vector.load %arg1[%c1, %c0_2] : memref<3x128xf32, #tpu.memory_space<vmem>>, vector<1x128xf32>
    %cst = arith.constant 4.000000e+00 : f32
    %8 = vector.broadcast %cst : f32 to vector<2x1xf32>
    %9 = arith.mulf %6, %8 : vector<2x1xf32>
    %10 = vector.broadcast %9 : vector<2x1xf32> to vector<2x128xf32>
    %11 = vector.broadcast %7 : vector<1x128xf32> to vector<2x128xf32>
    %12 = arith.addf %10, %11 : vector<2x128xf32>
    %13 = vector.broadcast %0 : vector<1x128xf32> to vector<2x128xf32>
    %14 = arith.mulf %12, %13 : vector<2x128xf32>
    %cst_3 = arith.constant 0.000000e+00 : f32
    %15 = vector.broadcast %cst_3 : f32 to vector<1x128xf32>
    %16 = arith.cmpf one, %1, %15 : vector<1x128xf32>
    %17 = math.cos %14 : vector<2x128xf32>
    %18 = math.sin %14 : vector<2x128xf32>
    %19 = vector.shape_cast %16 : vector<1x128xi1> to vector<1x128xi1>
    %20 = vector.broadcast %19 : vector<1x128xi1> to vector<2x128xi1>
    %21 = arith.select %20, %17, %18 : vector<2x128xi1>, vector<2x128xf32>
    %c0_4 = arith.constant 0 : index
    %c0_5 = arith.constant 0 : index
    %22 = vector.load %arg2[%c0_4, %c0_5] : memref<2x128xf32, #tpu.memory_space<vmem>>, vector<2x128xf32>
    tpu.vector_store %arg2[%c0_4, %c0_5], %21 {strides = array<i32>} : memref<2x128xf32, #tpu.memory_space<vmem>>, vector<2x128xf32>,
    return
  }
  func.func @transform_0(%arg0: i32) -> (i32, i32) {
    %c0_i32 = arith.constant 0 : i32
    %c0_i32_0 = arith.constant 0 : i32
    %c0_i32_1 = arith.constant 0 : i32
    return %c0_i32, %c0_i32_0 : i32, i32
  }
  func.func @transform_1(%arg0: i32) -> (i32, i32) {
    %c0_i32 = arith.constant 0 : i32
    %c0_i32_0 = arith.constant 0 : i32
    return %arg0, %c0_i32 : i32, i32
  }
}

</mosaic_0001>

<bundles_post_ra>
// kernel: build.1
= control target key start
LH: loop header
LB: loop body
LE: loop exit
PB: predicated region body
PF: predicated region fallthrough
CT: control target
= control target key end

     0   :  { %6 = vsyncpa [#allocation3], 0  ;;  %s309_s6 = smov [#allocation2]   ;;  %s358_s0 = inlined_call_operand.hbm [shape: f32[3,128], index: 0, kind: input, shape index: {}]   ;;  %s359_s1 = inlined_call_operand.vmem [shape: f32[2,128], index: 1, kind: output, shape index: {}]  }
   0x1   :  { %s13_s7 = sshll.u32 %s309_s6, 4  ;;  %s14_s7 = int_to_ptr.vmem [resolvable:$true] %s13_s7 }
   0x2   :  { %s295_s8 = scalar_lea.vmem %s14_s7, 64  ;;  %p300_p1 = scmp.lt.s32.totalorder %s14_s7, %s14_s7 }
   0x3   :  { %p296_p0 = scmp.ne.s32.totalorder %s14_s7, %s295_s8  ;;  %p301_p2 = scmp.lt.s32.totalorder %s295_s8, %s295_s8 }
   0x5   :  { %p302_p3 = por %p301_p2, %p300_p1 }
   0x7   :  { %p303_p4 = pnand %p302_p3, %p296_p0 }
   0x9   :  { %306 = shalt.err (!%p303_p4)
}
   0xa   :  { %16 = dma.hbm_to_vmem [thread:$0]  %s358_s0, 64, %s14_s7, [#allocation3]  }
   0xb   :  { %307 = dma.done.wait [#allocation3], 64  }
   0xc   :  { %308 = vsyncadd [#allocation3], 4294967232  ;;  %v23_v0 = vlaneseq  ;;  %v262_v4 = vld [vmem:[#allocation2] ss:$0 sm:$0xff]  ;;  %v261_v5 = vld [vmem:[#allocation2 + $0x1] ss:$0 sm:$0xff] }
   0xd   :  { %v310_v19 = vmov 683565275   ;;  %v311_v21 = vmov 2475754826   ;;  %v312_v23 = vmov 2131351028  }
   0xe   :  { %v330_v1 = vshrl.u32 %v23_v0, 7  ;;  %v313_v25 = vmov 2102212464   ;;  %v314_v27 = vmov 920167782  }
   0xf   :  { %v315_v34 = vmov 1326507024  }
  0x10   :  { %v27_v2 = vcvt.s32.f32 %v330_v1 }
  0x12   :  { %v29_v3 = vmul.f32 4.0, %v27_v2 }
  0x14   :  { %v34_v6 = vadd.f32 %v261_v5, %v29_v3 }
  0x16   :  { %v333_v7 = vmul.f32 %v262_v4, %v34_v6 }
  0x18   :  { %v44_v8 = vand.u32 2139095040, %v333_v7  ;;  %v41_v10 = vand.u32 2147483647, %v333_v7  ;;  %vm43_vm7 = vcmp.lt.s32.totalorder %v333_v7, 0 }
  0x1a   :  { %v45_v9 = vshrl.u32 %v44_v8, 23  ;;  %v48_v13 = vand.u32 8388607, %v41_v10  ;;  %vm42_vm8 = vcmp.le.f32.partialorder %v41_v10, 0.7853982 }
  0x1c   :  { %v263_v11 = vadd.s32 4294967169, %v45_v9  ;;  %v49_v16 = vor.u32 8388608, %v48_v13 }
  0x1e   :  { %v51_v12 = vadd.s32 1, %v263_v11  ;;  %v89_v36 = vshll.u32 %v49_v16, 8 }
  0x20   :  { %vm52_vm0 = vcmp.gt.s32.totalorder %v51_v12, 0 }
  0x21   :  { %v53_v14 = vsel %vm52_vm0, %v51_v12, 0  ;;  %vm133_vm0 = vweird.f32 %v333_v7 }
  0x22   :  { %v55_v15 = vand.u32 31, %v53_v14  ;;  %v54_v17 = vshrl.u32 %v53_v14, 5 }
  0x24   :  { %v56_v18 = vsub.s32 32, %v55_v15  ;;  %v58_v20 = vshll.u32 %v310_v19, %v55_v15  ;;  %v61_v22 = vshll.u32 %v311_v21, %v55_v15  ;;  %v64_v24 = vshll.u32 %v312_v23, %v55_v15 }
  0x25   :  { %v67_v26 = vshll.u32 %v313_v25, %v55_v15  ;;  %v70_v28 = vshll.u32 %v314_v27, %v55_v15  ;;  %vm73_vm1 = vcmp.lt.s32.totalorder %v54_v17, 1  ;;  %vm76_vm2 = vcmp.lt.s32.totalorder %v54_v17, 4 }
  0x26   :  { %v57_v29 = vshrl.u32 %v310_v19, %v56_v18  ;;  %v59_v30 = vshrl.u32 %v311_v21, %v56_v18  ;;  %v62_v31 = vshrl.u32 %v312_v23, %v56_v18  ;;  %v65_v32 = vshrl.u32 %v313_v25, %v56_v18 }
  0x27   :  { %v68_v33 = vshrl.u32 %v314_v27, %v56_v18  ;;  %v71_v35 = vshrl.u32 %v315_v34, %v56_v18  ;;  %vm74_vm3 = vcmp.lt.s32.totalorder %v54_v17, 2  ;;  %vm75_vm4 = vcmp.lt.s32.totalorder %v54_v17, 3 }
  0x28   :  { %v60_v37 = vor.u32 %v59_v30, %v58_v20  ;;  %v63_v38 = vor.u32 %v62_v31, %v61_v22  ;;  %v66_v39 = vor.u32 %v65_v32, %v64_v24  ;;  %v251_v32 = vsub.s32 0, %v330_v1 }
  0x29   :  { %v69_v40 = vor.u32 %v68_v33, %v67_v26  ;;  %v72_v41 = vor.u32 %v71_v35, %v70_v28  ;;  %v21_v28 = vld [vmem:[#allocation2 + $0x2] sm:$0x1]  ;;  %v316_v33 = vmov 0  }
  0x2a   :  { %v77_v42 = vsel %vm73_vm1, %v57_v29, %v60_v37  ;;  %v78_v43 = vsel %vm76_vm2, %v66_v39, 2102212464  ;;  %v81_v44 = vsel %vm73_vm1, %v60_v37, %v63_v38  ;;  %v85_v45 = vsel %vm73_vm1, %v63_v38, %v66_v39 }
  0x2b   :  { %v79_v46 = vsel %vm75_vm4, %v63_v38, %v78_v43  ;;  %v82_v47 = vsel %vm76_vm2, %v69_v40, 920167782  ;;  %v86_v48 = vsel %vm76_vm2, %v72_v41, 1326507024  ;;  %vm40_vm9 = vcmp.ne.f32.partialorder %v21_v28, 0.0 }
  0x2c   :  { %v83_v49 = vsel %vm75_vm4, %v66_v39, %v82_v47  ;;  %v87_v50 = vsel %vm75_vm4, %v69_v40, %v86_v48  ;;  %v80_v51 = vsel %vm74_vm3, %v77_v42, %v79_v46  ;;  %v248_v34 = vsel %vm40_vm9, 1, %v316_v33 }
  0x2d   :  { %v84_v52 = vsel %vm74_vm3, %v81_v44, %v83_v49  ;;  %v88_v53 = vsel %vm74_vm3, %v85_v45, %v87_v50  ;;  %v96_v58 = vmul.u32 %v89_v36, %v80_v51  ;;  %v252_v10 = vrot.slane %v248_v34, %v251_v32 }
  0x2e   :  { %v339_v54 = vmul.u32.u64.low %v89_v36, %v88_v53  ;;  %v340_v55 = vmul.u32.u64.high %v89_v36, %v88_v53, %v339_v54  ;;  %v342_v56 = vmul.u32.u64.low %v89_v36, %v84_v52  ;;  %v343_v57 = vmul.u32.u64.high %v89_v36, %v84_v52, %v342_v56 }
  0x2f   :  { %vm253_vm1 = vcmp.eq.s32.totalorder %v252_v10, 1 }
  0x30   :  { %vm98_vm5 = vc.u32 %v340_v55, %v342_v56  ;;  %v99_v59 = vadd.s32 1, %v343_v57  ;;  %v97_v8 = vadd.s32 %v342_v56, %v340_v55 }
  0x32   :  { %v100_v60 = vsel %vm98_vm5, %v99_v59, %v343_v57 }
  0x33   :  { %v101_v61 = vadd.s32 %v100_v60, %v96_v58 }
  0x35   :  { %v102_v62 = vadd.s32 536870912, %v101_v61 }
  0x37   :  { %v103_v63 = vshrl.u32 %v102_v62, 30 }
  0x39   :  { %v104_v0 = vshll.u32 %v103_v63, 30  ;;  %v127_v22 = vsub.s32 4, %v103_v63 }
  0x3b   :  { %v105_v2 = vsub.s32 %v101_v61, %v104_v0  ;;  %v128_v25 = vsel %vm43_vm7, %v127_v22, %v103_v63 }
  0x3c   :  { %v130_v27 = vsel %vm42_vm8, 0, %v128_v25 }
  0x3d   :  { %v107_v3 = vsub.s32 0, %v105_v2  ;;  %v237_v29 = vadd.s32 3, %v130_v27  ;;  %v134_v30 = vand.u32 3, %v130_v27 }
  0x3f   :  { %v264_v4 = vmin.u32 %v107_v3, %v105_v2  ;;  %v238_v31 = vand.u32 3, %v237_v29  ;;  %vm139_vm10 = vcmp.eq.s32.totalorder %v134_v30, 2  ;;  %vm136_vm12 = vcmp.eq.s32.totalorder %v134_v30, 0 }
  0x40   :  { %vm135_vm14 = vcmp.lt.s32.totalorder %v134_v30, 2 }
  0x41   :  { %v109_v5 = vclz %v264_v4  ;;  %vm243_vm11 = vcmp.eq.s32.totalorder %v238_v31, 2  ;;  %vm240_vm13 = vcmp.eq.s32.totalorder %v238_v31, 0  ;;  %vm239_vm15 = vcmp.lt.s32.totalorder %v238_v31, 2 }
  0x43   :  { %v265_v6 = vadd.s32 4294967294, %v109_v5 }
  0x45   :  { %vm266_vm6 = vcmp.lt.s32.totalorder %v265_v6, 0 }
  0x46   :  { %v112_v9 = vsel %vm266_vm6, 0, %v265_v6 }
  0x47   :  { %v113_v11 = vsub.s32 32, %v112_v9  ;;  %v114_v12 = vshll.u32 %v105_v2, %v112_v9  ;;  %v117_v13 = vsub.s32 4294967266, %v112_v9 }
  0x49   :  { %v115_v14 = vshrl.u32 %v97_v8, %v113_v11  ;;  %v118_v15 = vadd.s32 127, %v117_v13 }
  0x4b   :  { %v116_v16 = vor.u32 %v115_v14, %v114_v12  ;;  %v119_v17 = vshll.u32 %v118_v15, 23 }
  0x4d   :  { %v120_v18 = vor.u32 4788187, %v119_v17  ;;  %v123_v19 = vcvt.s32.f32 %v116_v16 }
  0x4f   :  { %v121_v20 = vand.u32 2147483647, %v120_v18 }
  0x51   :  { %v124_v21 = vmul.f32 %v123_v19, %v121_v20 }
  0x53   :  { %v125_v23 = vxor.u32 2147483648, %v124_v21 }
  0x55   :  { %v126_v24 = vsel %vm43_vm7, %v125_v23, %v124_v21 }
  0x56   :  { %v129_v26 = vsel %vm42_vm8, %v333_v7, %v126_v24 }
  0x57   :  { %283 = vcosq.f32 %v129_v26 }
  0x58   :  { %285 = vsinq.f32 %v129_v26 }
  0x64   :  { %v284_v35 = vpop.eup %283 }
  0x65   :  { %v286_v36 = vpop.eup %285  ;;  %v140_v37 = vxor.u32 2147483648, %v284_v35 }
  0x66   :  { %v137_v38 = vxor.u32 2147483648, %v286_v36 }
  0x67   :  { %v141_v39 = vsel %vm139_vm10, %v140_v37, %v286_v36  ;;  %v245_v40 = vsel %vm243_vm11, %v140_v37, %v286_v36 }
  0x68   :  { %v138_v41 = vsel %vm136_vm12, %v284_v35, %v137_v38  ;;  %v242_v42 = vsel %vm240_vm13, %v284_v35, %v137_v38 }
  0x69   :  { %v142_v1 = vsel %vm135_vm14, %v138_v41, %v141_v39  ;;  %v246_v43 = vsel %vm239_vm15, %v242_v42, %v245_v40 }
  0x6a   :  { %v143_v44 = vsel %vm133_vm0, nan, %v142_v1  ;;  %v247_v45 = vsel %vm133_vm0, nan, %v246_v43 }
  0x6b   :  { %v254_v46 = vsel %vm253_vm1, %v143_v44, %v247_v45 }
  0x6c   :  { %255 = vst [vmem:[%s359_s1] sm:$0x3] %v254_v46 }
  0x6d   :  { %260 = vsyncpa [#allocation3], 1 }

</bundles_post_ra>
